<compile_context>
chip_gen: v6e
topology: v6e:2x2x1
jax: 0.10.0
libtpu: 0.0.40
codegen_flags: <defaults>
</compile_context>

<pallas_src>
import functools

import jax
import jax.numpy as jnp
from jax.experimental import pallas as pl
from jax.experimental.pallas import tpu as pltpu


LN_EPS = 1e-5


def _round_up(n, m):
    return ((n + m - 1) // m) * m


def _layernorm(h, gamma, beta):
    # Two-pass (mean, then centered second moment) in f32 for stability.
    mu = jnp.mean(h, axis=-1, keepdims=True)
    var = jnp.mean((h - mu) ** 2, axis=-1, keepdims=True)
    return (h - mu) * jax.lax.rsqrt(var + LN_EPS) * gamma + beta


def actor_kernel(x_ref,
                 w1_ref, b1_ref, g1_ref, be1_ref,
                 w2_ref, b2_ref, g2_ref, be2_ref,
                 w3_ref, b3_ref,
                 o_ref):
    x = x_ref[...]

    # fc1 -> LayerNorm -> ReLU   (dot operands in weight dtype, accum f32)
    h = jnp.dot(x.astype(w1_ref.dtype), w1_ref[...],
                preferred_element_type=jnp.float32) + b1_ref[...]
    h = _layernorm(h, g1_ref[...], be1_ref[...])
    h = jnp.maximum(h, 0.0)

    # fc2 -> LayerNorm -> ReLU
    h = jnp.dot(h.astype(w2_ref.dtype), w2_ref[...],
                preferred_element_type=jnp.float32) + b2_ref[...]
    h = _layernorm(h, g2_ref[...], be2_ref[...])
    h = jnp.maximum(h, 0.0)

    # mu -> tanh -> scale/shift to [0, 1600]   (lane-dense, padded N)
    y = jnp.tanh(jnp.dot(h.astype(w3_ref.dtype), w3_ref[...],
                         preferred_element_type=jnp.float32) + b3_ref[...])
    o_ref[...] = (y * 800.0 + 800.0).astype(o_ref.dtype)


def _invariant_spec(shape, single_buffer):
    """BlockSpec for a grid-invariant operand (weights / biases / LN params)."""
    index_map = lambda i: (0,) * len(shape)
    if single_buffer and hasattr(pl, "Buffered"):
        return pl.BlockSpec(shape, index_map,
                            pipeline_mode=pl.Buffered(buffer_count=1))
    return pl.BlockSpec(shape, index_map)


@functools.partial(jax.jit, static_argnames=("tile_b", "single_buffer_params"))
def _actor_forward_impl(x, params, tile_b, single_buffer_params):
    (w1, b1, g1, be1, w2, b2, g2, be2, w3, b3) = params
    B, obs_dim = x.shape
    h1 = w1.shape[1]
    h2 = w2.shape[1]
    act = w3.shape[1]

    # Lane-dense output: pad the mu layer's N dim to a multiple of 128.
    act_pad = _round_up(act, 128)
    if act_pad != act:
        w3 = jnp.pad(w3, ((0, 0), (0, act_pad - act)))
        b3 = jnp.pad(b3, ((0, 0), (0, act_pad - act)))

    # Pad batch to a multiple of the batch tile.
    b_pad = _round_up(B, tile_b)
    if b_pad != B:
        x = jnp.pad(x, ((0, b_pad - B), (0, 0)))

    inv = lambda shape: _invariant_spec(shape, single_buffer_params)

    out = pl.pallas_call(
        actor_kernel,
        out_shape=jax.ShapeDtypeStruct((b_pad, act_pad), jnp.float32),
        grid_spec=pltpu.PrefetchScalarGridSpec(
            num_scalar_prefetch=0,
            grid=(b_pad // tile_b,),
            in_specs=[
                pl.BlockSpec((tile_b, obs_dim), lambda i: (i, 0)),   # x tile
                inv((obs_dim, h1)), inv((1, h1)),                    # fc1
                inv((1, h1)), inv((1, h1)),                          # ln1
                inv((h1, h2)), inv((1, h2)),                         # fc2
                inv((1, h2)), inv((1, h2)),                          # ln2
                inv((h2, act_pad)), inv((1, act_pad)),               # mu (padded)
            ],
            out_specs=pl.BlockSpec((tile_b, act_pad), lambda i: (i, 0)),
        ),
        compiler_params=pltpu.CompilerParams(
            dimension_semantics=("parallel",)),
    )(x, w1, b1, g1, be1, w2, b2, g2, be2, w3, b3)

    return out[:B, :act]


def actor_forward(x, params, tile_b=None, single_buffer_params=True):
    B = x.shape[0]
    if tile_b is None:
        # Big batch tiles: fill the MXU M dimension, amortize grid-step
        # overhead; still leaves >1 grid step (megacore sharding) for B > 256.
        tile_b = min(_round_up(B, 8), 256)
    assert tile_b % 8 == 0, "tile_b must be a multiple of 8 (sublane)"
    return _actor_forward_impl(x, params, tile_b, single_buffer_params)


def init_params(key, obs_dim, h1, h2, act, weight_dtype=jnp.float32):
    """Deterministic init mirroring the PyTorch module's init scheme.

    Weights stored [in, out]; optionally bf16 (MXU-native on v6e/v7x).
    Biases / LayerNorm params stay f32 (VPU work is done in f32).
    """
    ks = jax.random.split(key, 6)
    f1 = 1.0 / jnp.sqrt(h1)   # 1/sqrt(fc1.weight.size(0)) = 1/sqrt(fc1_dims)
    f2 = 1.0 / jnp.sqrt(h2)
    f3 = 0.003
    w1 = jax.random.uniform(ks[0], (obs_dim, h1), jnp.float32, -f1, f1).astype(weight_dtype)
    b1 = jax.random.uniform(ks[1], (1, h1), jnp.float32, -f1, f1)
    g1 = jnp.ones((1, h1), jnp.float32)
    be1 = jnp.zeros((1, h1), jnp.float32)
    w2 = jax.random.uniform(ks[2], (h1, h2), jnp.float32, -f2, f2).astype(weight_dtype)
    b2 = jax.random.uniform(ks[3], (1, h2), jnp.float32, -f2, f2)
    g2 = jnp.ones((1, h2), jnp.float32)
    be2 = jnp.zeros((1, h2), jnp.float32)
    w3 = jax.random.uniform(ks[4], (h2, act), jnp.float32, -f3, f3).astype(weight_dtype)
    b3 = jax.random.uniform(ks[5], (1, act), jnp.float32, -f3, f3)
    return (w1, b1, g1, be1, w2, b2, g2, be2, w3, b3)


def actor_forward_ref(x, params):
    """Pure-JAX reference mirroring the kernel's math (same dot dtypes)."""
    (w1, b1, g1, be1, w2, b2, g2, be2, w3, b3) = params
    dot = lambda a, w: jnp.dot(a.astype(w.dtype), w,
                               preferred_element_type=jnp.float32)
    h = dot(x, w1) + b1
    h = _layernorm(h, g1, be1)
    h = jnp.maximum(h, 0.0)
    h = dot(h, w2) + b2
    h = _layernorm(h, g2, be2)
    h = jnp.maximum(h, 0.0)
    return jnp.tanh(dot(h, w3) + b3) * 800.0 + 800.0


def _run(x, params, **kw):
    """Run the kernel; fall back to plain (double-buffered) invariant specs if
    the single-buffered pipeline mode is not supported by this JAX build."""
    try:
        return jax.block_until_ready(actor_forward(x, params, **kw))
    except Exception:
        return jax.block_until_ready(
            actor_forward(x, params, single_buffer_params=False, **kw))


if __name__ == "__main__":
    # Small shapes consistent with the module's MLP structure.
    B, OBS, H1, H2, ACT = 50, 32, 128, 128, 8
    key = jax.random.PRNGKey(0)
    kx, kp = jax.random.split(key)
    x = jax.random.normal(kx, (B, OBS), jnp.float32)

    # 1) f32 weights, explicit small batch tile -> multi-step grid + batch pad.
    params_f32 = init_params(kp, OBS, H1, H2, ACT, weight_dtype=jnp.float32)
    out = _run(x, params_f32, tile_b=16)
    ref = actor_forward_ref(x, params_f32)
    assert out.shape == (B, ACT)
    assert jnp.allclose(out, ref, atol=5e-2, rtol=1e-4), "f32 mismatch vs reference"

    # 2) bf16 matmul operands (MXU-peak path on v6e/v7x), default tiling.
    params_bf16 = init_params(kp, OBS, H1, H2, ACT, weight_dtype=jnp.bfloat16)
    out_bf = _run(x, params_bf16)
    ref_bf = actor_forward_ref(x, params_bf16)
    assert out_bf.shape == (B, ACT)
    assert jnp.allclose(out_bf, ref_bf, atol=4.0, rtol=2e-2), "bf16 mismatch vs reference"

    # TODO(synk): checkpoint save/load and the Adam optimizer from the PyTorch
    # module are training/IO concerns with no Pallas forward-pass equivalent.
    print("KERNEL_OK")
</pallas_src>

<mosaic_0001>
module attributes {stable_mosaic.version = 11 : i64} {
  func.func @actor_kernel(%arg0: i32, %arg1: memref<16x32xf32, #tpu.memory_space<vmem>>, %arg2: memref<32x128xf32, #tpu.memory_space<vmem>>, %arg3: memref<1x128xf32, #tpu.memory_space<vmem>>, %arg4: memref<1x128xf32, #tpu.memory_space<vmem>>, %arg5: memref<1x128xf32, #tpu.memory_space<vmem>>, %arg6: memref<128x128xf32, #tpu.memory_space<vmem>>, %arg7: memref<1x128xf32, #tpu.memory_space<vmem>>, %arg8: memref<1x128xf32, #tpu.memory_space<vmem>>, %arg9: memref<1x128xf32, #tpu.memory_space<vmem>>, %arg10: memref<128x128xf32, #tpu.memory_space<vmem>>, %arg11: memref<1x128xf32, #tpu.memory_space<vmem>>, %arg12: memref<16x128xf32, #tpu.memory_space<vmem>>) attributes {dimension_semantics = [#tpu.dimension_semantics<parallel>], iteration_bounds = array<i64: 4>, scalar_prefetch = 0 : i64, scratch_operands = 0 : i64, tpu.core_type = #tpu.core_type<tc>, window_params = [{transform_indices = @transform_0, window_bounds = array<i64: 16, 32>}, {pipeline_mode = #tpu.pipeline_mode<synchronous>, transform_indices = @transform_1, window_bounds = array<i64: 32, 128>}, {pipeline_mode = #tpu.pipeline_mode<synchronous>, transform_indices = @transform_2, window_bounds = array<i64: 1, 128>}, {pipeline_mode = #tpu.pipeline_mode<synchronous>, transform_indices = @transform_3, window_bounds = array<i64: 1, 128>}, {pipeline_mode = #tpu.pipeline_mode<synchronous>, transform_indices = @transform_4, window_bounds = array<i64: 1, 128>}, {pipeline_mode = #tpu.pipeline_mode<synchronous>, transform_indices = @transform_5, window_bounds = array<i64: 128, 128>}, {pipeline_mode = #tpu.pipeline_mode<synchronous>, transform_indices = @transform_6, window_bounds = array<i64: 1, 128>}, {pipeline_mode = #tpu.pipeline_mode<synchronous>, transform_indices = @transform_7, window_bounds = array<i64: 1, 128>}, {pipeline_mode = #tpu.pipeline_mode<synchronous>, transform_indices = @transform_8, window_bounds = array<i64: 1, 128>}, {pipeline_mode = #tpu.pipeline_mode<synchronous>, transform_indices = @transform_9, window_bounds = array<i64: 128, 128>}, {pipeline_mode = #tpu.pipeline_mode<synchronous>, transform_indices = @transform_10, window_bounds = array<i64: 1, 128>}, {transform_indices = @transform_11, window_bounds = array<i64: 16, 128>}]} {
    %c0 = arith.constant 0 : index
    %c0_0 = arith.constant 0 : index
    %0 = vector.load %arg1[%c0, %c0_0] : memref<16x32xf32, #tpu.memory_space<vmem>>, vector<16x32xf32>
    %c0_1 = arith.constant 0 : index
    %c0_2 = arith.constant 0 : index
    %1 = vector.load %arg2[%c0_1, %c0_2] : memref<32x128xf32, #tpu.memory_space<vmem>>, vector<32x128xf32>
    %cst = arith.constant dense<0.000000e+00> : vector<16x128xf32>
    %2 = tpu.matmul %0, %1, %cst {dimension_numbers = #tpu.dot_dimension_numbers<[1], [0], [0], [1], [0, 0, 1, 1], [], []>} : vector<16x32xf32>, vector<32x128xf32>, vector<16x128xf32> -> vector<16x128xf32>
    %c0_3 = arith.constant 0 : index
    %c0_4 = arith.constant 0 : index
    %3 = vector.load %arg3[%c0_3, %c0_4] : memref<1x128xf32, #tpu.memory_space<vmem>>, vector<1x128xf32>
    %4 = vector.broadcast %3 : vector<1x128xf32> to vector<16x128xf32>
    %5 = arith.addf %2, %4 : vector<16x128xf32>
    %c0_5 = arith.constant 0 : index
    %c0_6 = arith.constant 0 : index
    %6 = vector.load %arg4[%c0_5, %c0_6] : memref<1x128xf32, #tpu.memory_space<vmem>>, vector<1x128xf32>
    %c0_7 = arith.constant 0 : index
    %c0_8 = arith.constant 0 : index
    %7 = vector.load %arg5[%c0_7, %c0_8] : memref<1x128xf32, #tpu.memory_space<vmem>>, vector<1x128xf32>
    %cst_9 = arith.constant dense<0.000000e+00> : vector<16xf32>
    %8 = vector.multi_reduction <add>, %5, %cst_9 [1] : vector<16x128xf32> to vector<16xf32>
    %9 = vector.shape_cast %8 : vector<16xf32> to vector<16x1xf32>
    %cst_10 = arith.constant 1.280000e+02 : f32
    %10 = vector.broadcast %cst_10 : f32 to vector<16x1xf32>
    %11 = arith.divf %9, %10 : vector<16x1xf32>
    %12 = vector.broadcast %11 : vector<16x1xf32> to vector<16x128xf32>
    %13 = arith.subf %5, %12 : vector<16x128xf32>
    %14 = arith.mulf %13, %13 : vector<16x128xf32>
    %cst_11 = arith.constant dense<0.000000e+00> : vector<16xf32>
    %15 = vector.multi_reduction <add>, %14, %cst_11 [1] : vector<16x128xf32> to vector<16xf32>
    %16 = vector.shape_cast %15 : vector<16xf32> to vector<16x1xf32>
    %cst_12 = arith.constant 1.280000e+02 : f32
    %17 = vector.broadcast %cst_12 : f32 to vector<16x1xf32>
    %18 = arith.divf %16, %17 : vector<16x1xf32>
    %19 = vector.broadcast %11 : vector<16x1xf32> to vector<16x128xf32>
    %20 = arith.subf %5, %19 : vector<16x128xf32>
    %cst_13 = arith.constant 9.99999974E-6 : f32
    %21 = vector.broadcast %cst_13 : f32 to vector<16x1xf32>
    %22 = arith.addf %18, %21 : vector<16x1xf32>
    %23 = math.rsqrt %22 : vector<16x1xf32>
    %24 = vector.broadcast %23 : vector<16x1xf32> to vector<16x128xf32>
    %25 = arith.mulf %20, %24 : vector<16x128xf32>
    %26 = vector.broadcast %6 : vector<1x128xf32> to vector<16x128xf32>
    %27 = arith.mulf %25, %26 : vector<16x128xf32>
    %28 = vector.broadcast %7 : vector<1x128xf32> to vector<16x128xf32>
    %29 = arith.addf %27, %28 : vector<16x128xf32>
    %cst_14 = arith.constant 0.000000e+00 : f32
    %30 = vector.broadcast %cst_14 : f32 to vector<16x128xf32>
    %31 = arith.maximumf %29, %30 : vector<16x128xf32>
    %c0_15 = arith.constant 0 : index
    %c0_16 = arith.constant 0 : index
    %32 = vector.load %arg6[%c0_15, %c0_16] : memref<128x128xf32, #tpu.memory_space<vmem>>, vector<128x128xf32>
    %cst_17 = arith.constant dense<0.000000e+00> : vector<16x128xf32>
    %33 = tpu.matmul %31, %32, %cst_17 {dimension_numbers = #tpu.dot_dimension_numbers<[1], [0], [0], [1], [0, 0, 1, 1], [], []>} : vector<16x128xf32>, vector<128x128xf32>, vector<16x128xf32> -> vector<16x128xf32>
    %c0_18 = arith.constant 0 : index
    %c0_19 = arith.constant 0 : index
    %34 = vector.load %arg7[%c0_18, %c0_19] : memref<1x128xf32, #tpu.memory_space<vmem>>, vector<1x128xf32>
    %35 = vector.broadcast %34 : vector<1x128xf32> to vector<16x128xf32>
    %36 = arith.addf %33, %35 : vector<16x128xf32>
    %c0_20 = arith.constant 0 : index
    %c0_21 = arith.constant 0 : index
    %37 = vector.load %arg8[%c0_20, %c0_21] : memref<1x128xf32, #tpu.memory_space<vmem>>, vector<1x128xf32>
    %c0_22 = arith.constant 0 : index
    %c0_23 = arith.constant 0 : index
    %38 = vector.load %arg9[%c0_22, %c0_23] : memref<1x128xf32, #tpu.memory_space<vmem>>, vector<1x128xf32>
    %cst_24 = arith.constant dense<0.000000e+00> : vector<16xf32>
    %39 = vector.multi_reduction <add>, %36, %cst_24 [1] : vector<16x128xf32> to vector<16xf32>
    %40 = vector.shape_cast %39 : vector<16xf32> to vector<16x1xf32>
    %cst_25 = arith.constant 1.280000e+02 : f32
    %41 = vector.broadcast %cst_25 : f32 to vector<16x1xf32>
    %42 = arith.divf %40, %41 : vector<16x1xf32>
    %43 = vector.broadcast %42 : vector<16x1xf32> to vector<16x128xf32>
    %44 = arith.subf %36, %43 : vector<16x128xf32>
    %45 = arith.mulf %44, %44 : vector<16x128xf32>
    %cst_26 = arith.constant dense<0.000000e+00> : vector<16xf32>
    %46 = vector.multi_reduction <add>, %45, %cst_26 [1] : vector<16x128xf32> to vector<16xf32>
    %47 = vector.shape_cast %46 : vector<16xf32> to vector<16x1xf32>
    %cst_27 = arith.constant 1.280000e+02 : f32
    %48 = vector.broadcast %cst_27 : f32 to vector<16x1xf32>
    %49 = arith.divf %47, %48 : vector<16x1xf32>
    %50 = vector.broadcast %42 : vector<16x1xf32> to vector<16x128xf32>
    %51 = arith.subf %36, %50 : vector<16x128xf32>
    %cst_28 = arith.constant 9.99999974E-6 : f32
    %52 = vector.broadcast %cst_28 : f32 to vector<16x1xf32>
    %53 = arith.addf %49, %52 : vector<16x1xf32>
    %54 = math.rsqrt %53 : vector<16x1xf32>
    %55 = vector.broadcast %54 : vector<16x1xf32> to vector<16x128xf32>
    %56 = arith.mulf %51, %55 : vector<16x128xf32>
    %57 = vector.broadcast %37 : vector<1x128xf32> to vector<16x128xf32>
    %58 = arith.mulf %56, %57 : vector<16x128xf32>
    %59 = vector.broadcast %38 : vector<1x128xf32> to vector<16x128xf32>
    %60 = arith.addf %58, %59 : vector<16x128xf32>
    %cst_29 = arith.constant 0.000000e+00 : f32
    %61 = vector.broadcast %cst_29 : f32 to vector<16x128xf32>
    %62 = arith.maximumf %60, %61 : vector<16x128xf32>
    %c0_30 = arith.constant 0 : index
    %c0_31 = arith.constant 0 : index
    %63 = vector.load %arg10[%c0_30, %c0_31] : memref<128x128xf32, #tpu.memory_space<vmem>>, vector<128x128xf32>
    %cst_32 = arith.constant dense<0.000000e+00> : vector<16x128xf32>
    %64 = tpu.matmul %62, %63, %cst_32 {dimension_numbers = #tpu.dot_dimension_numbers<[1], [0], [0], [1], [0, 0, 1, 1], [], []>} : vector<16x128xf32>, vector<128x128xf32>, vector<16x128xf32> -> vector<16x128xf32>
    %c0_33 = arith.constant 0 : index
    %c0_34 = arith.constant 0 : index
    %65 = vector.load %arg11[%c0_33, %c0_34] : memref<1x128xf32, #tpu.memory_space<vmem>>, vector<1x128xf32>
    %66 = vector.broadcast %65 : vector<1x128xf32> to vector<16x128xf32>
    %67 = arith.addf %64, %66 : vector<16x128xf32>
    %68 = math.tanh %67 : vector<16x128xf32>
    %cst_35 = arith.constant 8.000000e+02 : f32
    %69 = vector.broadcast %cst_35 : f32 to vector<16x128xf32>
    %70 = arith.mulf %68, %69 : vector<16x128xf32>
    %cst_36 = arith.constant 8.000000e+02 : f32
    %71 = vector.broadcast %cst_36 : f32 to vector<16x128xf32>
    %72 = arith.addf %70, %71 : vector<16x128xf32>
    %c0_37 = arith.constant 0 : index
    %c0_38 = arith.constant 0 : index
    %73 = vector.load %arg12[%c0_37, %c0_38] : memref<16x128xf32, #tpu.memory_space<vmem>>, vector<16x128xf32>
    tpu.vector_store %arg12[%c0_37, %c0_38], %72 {strides = array<i32>} : memref<16x128xf32, #tpu.memory_space<vmem>>, vector<16x128xf32>,
    return
  }
  func.func @transform_0(%arg0: i32) -> (i32, i32) {
    %c0_i32 = arith.constant 0 : i32
    %c0_i32_0 = arith.constant 0 : i32
    return %arg0, %c0_i32 : i32, i32
  }
  func.func @transform_1(%arg0: i32) -> (i32, i32) {
    %c0_i32 = arith.constant 0 : i32
    %c0_i32_0 = arith.constant 0 : i32
    %c0_i32_1 = arith.constant 0 : i32
    return %c0_i32, %c0_i32_0 : i32, i32
  }
  func.func @transform_2(%arg0: i32) -> (i32, i32) {
    %c0_i32 = arith.constant 0 : i32
    %c0_i32_0 = arith.constant 0 : i32
    %c0_i32_1 = arith.constant 0 : i32
    return %c0_i32, %c0_i32_0 : i32, i32
  }
  func.func @transform_3(%arg0: i32) -> (i32, i32) {
    %c0_i32 = arith.constant 0 : i32
    %c0_i32_0 = arith.constant 0 : i32
    %c0_i32_1 = arith.constant 0 : i32
    return %c0_i32, %c0_i32_0 : i32, i32
  }
  func.func @transform_4(%arg0: i32) -> (i32, i32) {
    %c0_i32 = arith.constant 0 : i32
    %c0_i32_0 = arith.constant 0 : i32
    %c0_i32_1 = arith.constant 0 : i32
    return %c0_i32, %c0_i32_0 : i32, i32
  }
  func.func @transform_5(%arg0: i32) -> (i32, i32) {
    %c0_i32 = arith.constant 0 : i32
    %c0_i32_0 = arith.constant 0 : i32
    %c0_i32_1 = arith.constant 0 : i32
    return %c0_i32, %c0_i32_0 : i32, i32
  }
  func.func @transform_6(%arg0: i32) -> (i32, i32) {
    %c0_i32 = arith.constant 0 : i32
    %c0_i32_0 = arith.constant 0 : i32
    %c0_i32_1 = arith.constant 0 : i32
    return %c0_i32, %c0_i32_0 : i32, i32
  }
  func.func @transform_7(%arg0: i32) -> (i32, i32) {
    %c0_i32 = arith.constant 0 : i32
    %c0_i32_0 = arith.constant 0 : i32
    %c0_i32_1 = arith.constant 0 : i32
    return %c0_i32, %c0_i32_0 : i32, i32
  }
  func.func @transform_8(%arg0: i32) -> (i32, i32) {
    %c0_i32 = arith.constant 0 : i32
    %c0_i32_0 = arith.constant 0 : i32
    %c0_i32_1 = arith.constant 0 : i32
    return %c0_i32, %c0_i32_0 : i32, i32
  }
  func.func @transform_9(%arg0: i32) -> (i32, i32) {
    %c0_i32 = arith.constant 0 : i32
    %c0_i32_0 = arith.constant 0 : i32
    %c0_i32_1 = arith.constant 0 : i32
    return %c0_i32, %c0_i32_0 : i32, i32
  }
  func.func @transform_10(%arg0: i32) -> (i32, i32) {
    %c0_i32 = arith.constant 0 : i32
    %c0_i32_0 = arith.constant 0 : i32
    %c0_i32_1 = arith.constant 0 : i32
    return %c0_i32, %c0_i32_0 : i32, i32
  }
  func.func @transform_11(%arg0: i32) -> (i32, i32) {
    %c0_i32 = arith.constant 0 : i32
    %c0_i32_0 = arith.constant 0 : i32
    return %arg0, %c0_i32 : i32, i32
  }
}

module attributes {stable_mosaic.version = 11 : i64} {
  func.func @actor_kernel(%arg0: i32, %arg1: memref<16x32xf32, #tpu.memory_space<vmem>>, %arg2: memref<32x128xf32, #tpu.memory_space<vmem>>, %arg3: memref<1x128xf32, #tpu.memory_space<vmem>>, %arg4: memref<1x128xf32, #tpu.memory_space<vmem>>, %arg5: memref<1x128xf32, #tpu.memory_space<vmem>>, %arg6: memref<128x128xf32, #tpu.memory_space<vmem>>, %arg7: memref<1x128xf32, #tpu.memory_space<vmem>>, %arg8: memref<1x128xf32, #tpu.memory_space<vmem>>, %arg9: memref<1x128xf32, #tpu.memory_space<vmem>>, %arg10: memref<128x128xf32, #tpu.memory_space<vmem>>, %arg11: memref<1x128xf32, #tpu.memory_space<vmem>>, %arg12: memref<16x128xf32, #tpu.memory_space<vmem>>) attributes {dimension_semantics = [#tpu.dimension_semantics<parallel>], iteration_bounds = array<i64: 4>, scalar_prefetch = 0 : i64, scratch_operands = 0 : i64, tpu.core_type = #tpu.core_type<tc>, window_params = [{transform_indices = @transform_0, window_bounds = array<i64: 16, 32>}, {pipeline_mode = #tpu.pipeline_mode<synchronous>, transform_indices = @transform_1, window_bounds = array<i64: 32, 128>}, {pipeline_mode = #tpu.pipeline_mode<synchronous>, transform_indices = @transform_2, window_bounds = array<i64: 1, 128>}, {pipeline_mode = #tpu.pipeline_mode<synchronous>, transform_indices = @transform_3, window_bounds = array<i64: 1, 128>}, {pipeline_mode = #tpu.pipeline_mode<synchronous>, transform_indices = @transform_4, window_bounds = array<i64: 1, 128>}, {pipeline_mode = #tpu.pipeline_mode<synchronous>, transform_indices = @transform_5, window_bounds = array<i64: 128, 128>}, {pipeline_mode = #tpu.pipeline_mode<synchronous>, transform_indices = @transform_6, window_bounds = array<i64: 1, 128>}, {pipeline_mode = #tpu.pipeline_mode<synchronous>, transform_indices = @transform_7, window_bounds = array<i64: 1, 128>}, {pipeline_mode = #tpu.pipeline_mode<synchronous>, transform_indices = @transform_8, window_bounds = array<i64: 1, 128>}, {pipeline_mode = #tpu.pipeline_mode<synchronous>, transform_indices = @transform_9, window_bounds = array<i64: 128, 128>}, {pipeline_mode = #tpu.pipeline_mode<synchronous>, transform_indices = @transform_10, window_bounds = array<i64: 1, 128>}, {transform_indices = @transform_11, window_bounds = array<i64: 16, 128>}]} {
    %c0 = arith.constant 0 : index
    %c0_0 = arith.constant 0 : index
    %0 = vector.load %arg1[%c0, %c0_0] : memref<16x32xf32, #tpu.memory_space<vmem>>, vector<16x32xf32>
    %c0_1 = arith.constant 0 : index
    %c0_2 = arith.constant 0 : index
    %1 = vector.load %arg2[%c0_1, %c0_2] : memref<32x128xf32, #tpu.memory_space<vmem>>, vector<32x128xf32>
    %cst = arith.constant dense<0.000000e+00> : vector<16x128xf32>
    %2 = tpu.matmul %0, %1, %cst {dimension_numbers = #tpu.dot_dimension_numbers<[1], [0], [0], [1], [0, 0, 1, 1], [], []>} : vector<16x32xf32>, vector<32x128xf32>, vector<16x128xf32> -> vector<16x128xf32>
    %c0_3 = arith.constant 0 : index
    %c0_4 = arith.constant 0 : index
    %3 = vector.load %arg3[%c0_3, %c0_4] : memref<1x128xf32, #tpu.memory_space<vmem>>, vector<1x128xf32>
    %4 = vector.broadcast %3 : vector<1x128xf32> to vector<16x128xf32>
    %5 = arith.addf %2, %4 : vector<16x128xf32>
    %c0_5 = arith.constant 0 : index
    %c0_6 = arith.constant 0 : index
    %6 = vector.load %arg4[%c0_5, %c0_6] : memref<1x128xf32, #tpu.memory_space<vmem>>, vector<1x128xf32>
    %c0_7 = arith.constant 0 : index
    %c0_8 = arith.constant 0 : index
    %7 = vector.load %arg5[%c0_7, %c0_8] : memref<1x128xf32, #tpu.memory_space<vmem>>, vector<1x128xf32>
    %cst_9 = arith.constant dense<0.000000e+00> : vector<16xf32>
    %8 = vector.multi_reduction <add>, %5, %cst_9 [1] : vector<16x128xf32> to vector<16xf32>
    %9 = vector.shape_cast %8 : vector<16xf32> to vector<16x1xf32>
    %cst_10 = arith.constant 1.280000e+02 : f32
    %10 = vector.broadcast %cst_10 : f32 to vector<16x1xf32>
    %11 = arith.divf %9, %10 : vector<16x1xf32>
    %12 = vector.broadcast %11 : vector<16x1xf32> to vector<16x128xf32>
    %13 = arith.subf %5, %12 : vector<16x128xf32>
    %14 = arith.mulf %13, %13 : vector<16x128xf32>
    %cst_11 = arith.constant dense<0.000000e+00> : vector<16xf32>
    %15 = vector.multi_reduction <add>, %14, %cst_11 [1] : vector<16x128xf32> to vector<16xf32>
    %16 = vector.shape_cast %15 : vector<16xf32> to vector<16x1xf32>
    %cst_12 = arith.constant 1.280000e+02 : f32
    %17 = vector.broadcast %cst_12 : f32 to vector<16x1xf32>
    %18 = arith.divf %16, %17 : vector<16x1xf32>
    %19 = vector.broadcast %11 : vector<16x1xf32> to vector<16x128xf32>
    %20 = arith.subf %5, %19 : vector<16x128xf32>
    %cst_13 = arith.constant 9.99999974E-6 : f32
    %21 = vector.broadcast %cst_13 : f32 to vector<16x1xf32>
    %22 = arith.addf %18, %21 : vector<16x1xf32>
    %23 = math.rsqrt %22 : vector<16x1xf32>
    %24 = vector.broadcast %23 : vector<16x1xf32> to vector<16x128xf32>
    %25 = arith.mulf %20, %24 : vector<16x128xf32>
    %26 = vector.broadcast %6 : vector<1x128xf32> to vector<16x128xf32>
    %27 = arith.mulf %25, %26 : vector<16x128xf32>
    %28 = vector.broadcast %7 : vector<1x128xf32> to vector<16x128xf32>
    %29 = arith.addf %27, %28 : vector<16x128xf32>
    %cst_14 = arith.constant 0.000000e+00 : f32
    %30 = vector.broadcast %cst_14 : f32 to vector<16x128xf32>
    %31 = arith.maximumf %29, %30 : vector<16x128xf32>
    %c0_15 = arith.constant 0 : index
    %c0_16 = arith.constant 0 : index
    %32 = vector.load %arg6[%c0_15, %c0_16] : memref<128x128xf32, #tpu.memory_space<vmem>>, vector<128x128xf32>
    %cst_17 = arith.constant dense<0.000000e+00> : vector<16x128xf32>
    %33 = tpu.matmul %31, %32, %cst_17 {dimension_numbers = #tpu.dot_dimension_numbers<[1], [0], [0], [1], [0, 0, 1, 1], [], []>} : vector<16x128xf32>, vector<128x128xf32>, vector<16x128xf32> -> vector<16x128xf32>
    %c0_18 = arith.constant 0 : index
    %c0_19 = arith.constant 0 : index
    %34 = vector.load %arg7[%c0_18, %c0_19] : memref<1x128xf32, #tpu.memory_space<vmem>>, vector<1x128xf32>
    %35 = vector.broadcast %34 : vector<1x128xf32> to vector<16x128xf32>
    %36 = arith.addf %33, %35 : vector<16x128xf32>
    %c0_20 = arith.constant 0 : index
    %c0_21 = arith.constant 0 : index
    %37 = vector.load %arg8[%c0_20, %c0_21] : memref<1x128xf32, #tpu.memory_space<vmem>>, vector<1x128xf32>
    %c0_22 = arith.constant 0 : index
    %c0_23 = arith.constant 0 : index
    %38 = vector.load %arg9[%c0_22, %c0_23] : memref<1x128xf32, #tpu.memory_space<vmem>>, vector<1x128xf32>
    %cst_24 = arith.constant dense<0.000000e+00> : vector<16xf32>
    %39 = vector.multi_reduction <add>, %36, %cst_24 [1] : vector<16x128xf32> to vector<16xf32>
    %40 = vector.shape_cast %39 : vector<16xf32> to vector<16x1xf32>
    %cst_25 = arith.constant 1.280000e+02 : f32
    %41 = vector.broadcast %cst_25 : f32 to vector<16x1xf32>
    %42 = arith.divf %40, %41 : vector<16x1xf32>
    %43 = vector.broadcast %42 : vector<16x1xf32> to vector<16x128xf32>
    %44 = arith.subf %36, %43 : vector<16x128xf32>
    %45 = arith.mulf %44, %44 : vector<16x128xf32>
    %cst_26 = arith.constant dense<0.000000e+00> : vector<16xf32>
    %46 = vector.multi_reduction <add>, %45, %cst_26 [1] : vector<16x128xf32> to vector<16xf32>
    %47 = vector.shape_cast %46 : vector<16xf32> to vector<16x1xf32>
    %cst_27 = arith.constant 1.280000e+02 : f32
    %48 = vector.broadcast %cst_27 : f32 to vector<16x1xf32>
    %49 = arith.divf %47, %48 : vector<16x1xf32>
    %50 = vector.broadcast %42 : vector<16x1xf32> to vector<16x128xf32>
    %51 = arith.subf %36, %50 : vector<16x128xf32>
    %cst_28 = arith.constant 9.99999974E-6 : f32
    %52 = vector.broadcast %cst_28 : f32 to vector<16x1xf32>
    %53 = arith.addf %49, %52 : vector<16x1xf32>
    %54 = math.rsqrt %53 : vector<16x1xf32>
    %55 = vector.broadcast %54 : vector<16x1xf32> to vector<16x128xf32>
    %56 = arith.mulf %51, %55 : vector<16x128xf32>
    %57 = vector.broadcast %37 : vector<1x128xf32> to vector<16x128xf32>
    %58 = arith.mulf %56, %57 : vector<16x128xf32>
    %59 = vector.broadcast %38 : vector<1x128xf32> to vector<16x128xf32>
    %60 = arith.addf %58, %59 : vector<16x128xf32>
    %cst_29 = arith.constant 0.000000e+00 : f32
    %61 = vector.broadcast %cst_29 : f32 to vector<16x128xf32>
    %62 = arith.maximumf %60, %61 : vector<16x128xf32>
    %c0_30 = arith.constant 0 : index
    %c0_31 = arith.constant 0 : index
    %63 = vector.load %arg10[%c0_30, %c0_31] : memref<128x128xf32, #tpu.memory_space<vmem>>, vector<128x128xf32>
    %cst_32 = arith.constant dense<0.000000e+00> : vector<16x128xf32>
    %64 = tpu.matmul %62, %63, %cst_32 {dimension_numbers = #tpu.dot_dimension_numbers<[1], [0], [0], [1], [0, 0, 1, 1], [], []>} : vector<16x128xf32>, vector<128x128xf32>, vector<16x128xf32> -> vector<16x128xf32>
    %c0_33 = arith.constant 0 : index
    %c0_34 = arith.constant 0 : index
    %65 = vector.load %arg11[%c0_33, %c0_34] : memref<1x128xf32, #tpu.memory_space<vmem>>, vector<1x128xf32>
    %66 = vector.broadcast %65 : vector<1x128xf32> to vector<16x128xf32>
    %67 = arith.addf %64, %66 : vector<16x128xf32>
    %68 = math.tanh %67 : vector<16x128xf32>
    %cst_35 = arith.constant 8.000000e+02 : f32
    %69 = vector.broadcast %cst_35 : f32 to vector<16x128xf32>
    %70 = arith.mulf %68, %69 : vector<16x128xf32>
    %cst_36 = arith.constant 8.000000e+02 : f32
    %71 = vector.broadcast %cst_36 : f32 to vector<16x128xf32>
    %72 = arith.addf %70, %71 : vector<16x128xf32>
    %c0_37 = arith.constant 0 : index
    %c0_38 = arith.constant 0 : index
    %73 = vector.load %arg12[%c0_37, %c0_38] : memref<16x128xf32, #tpu.memory_space<vmem>>, vector<16x128xf32>
    tpu.vector_store %arg12[%c0_37, %c0_38], %72 {strides = array<i32>} : memref<16x128xf32, #tpu.memory_space<vmem>>, vector<16x128xf32>,
    return
  }
  func.func @transform_0(%arg0: i32) -> (i32, i32) {
    %c0_i32 = arith.constant 0 : i32
    %c0_i32_0 = arith.constant 0 : i32
    return %arg0, %c0_i32 : i32, i32
  }
  func.func @transform_1(%arg0: i32) -> (i32, i32) {
    %c0_i32 = arith.constant 0 : i32
    %c0_i32_0 = arith.constant 0 : i32
    %c0_i32_1 = arith.constant 0 : i32
    return %c0_i32, %c0_i32_0 : i32, i32
  }
  func.func @transform_2(%arg0: i32) -> (i32, i32) {
    %c0_i32 = arith.constant 0 : i32
    %c0_i32_0 = arith.constant 0 : i32
    %c0_i32_1 = arith.constant 0 : i32
    return %c0_i32, %c0_i32_0 : i32, i32
  }
  func.func @transform_3(%arg0: i32) -> (i32, i32) {
    %c0_i32 = arith.constant 0 : i32
    %c0_i32_0 = arith.constant 0 : i32
    %c0_i32_1 = arith.constant 0 : i32
    return %c0_i32, %c0_i32_0 : i32, i32
  }
  func.func @transform_4(%arg0: i32) -> (i32, i32) {
    %c0_i32 = arith.constant 0 : i32
    %c0_i32_0 = arith.constant 0 : i32
    %c0_i32_1 = arith.constant 0 : i32
    return %c0_i32, %c0_i32_0 : i32, i32
  }
  func.func @transform_5(%arg0: i32) -> (i32, i32) {
    %c0_i32 = arith.constant 0 : i32
    %c0_i32_0 = arith.constant 0 : i32
    %c0_i32_1 = arith.constant 0 : i32
    return %c0_i32, %c0_i32_0 : i32, i32
  }
  func.func @transform_6(%arg0: i32) -> (i32, i32) {
    %c0_i32 = arith.constant 0 : i32
    %c0_i32_0 = arith.constant 0 : i32
    %c0_i32_1 = arith.constant 0 : i32
    return %c0_i32, %c0_i32_0 : i32, i32
  }
  func.func @transform_7(%arg0: i32) -> (i32, i32) {
    %c0_i32 = arith.constant 0 : i32
    %c0_i32_0 = arith.constant 0 : i32
    %c0_i32_1 = arith.constant 0 : i32
    return %c0_i32, %c0_i32_0 : i32, i32
  }
  func.func @transform_8(%arg0: i32) -> (i32, i32) {
    %c0_i32 = arith.constant 0 : i32
    %c0_i32_0 = arith.constant 0 : i32
    %c0_i32_1 = arith.constant 0 : i32
    return %c0_i32, %c0_i32_0 : i32, i32
  }
  func.func @transform_9(%arg0: i32) -> (i32, i32) {
    %c0_i32 = arith.constant 0 : i32
    %c0_i32_0 = arith.constant 0 : i32
    %c0_i32_1 = arith.constant 0 : i32
    return %c0_i32, %c0_i32_0 : i32, i32
  }
  func.func @transform_10(%arg0: i32) -> (i32, i32) {
    %c0_i32 = arith.constant 0 : i32
    %c0_i32_0 = arith.constant 0 : i32
    %c0_i32_1 = arith.constant 0 : i32
    return %c0_i32, %c0_i32_0 : i32, i32
  }
  func.func @transform_11(%arg0: i32) -> (i32, i32) {
    %c0_i32 = arith.constant 0 : i32
    %c0_i32_0 = arith.constant 0 : i32
    return %arg0, %c0_i32 : i32, i32
  }
}

</mosaic_0001>

<bundles_post_ra>
// kernel: _actor_forward_impl.1
= control target key start
LH: loop header
LB: loop body
LE: loop exit
PB: predicated region body
PF: predicated region fallthrough
CT: control target
= control target key end

     0   :  { %s1061_s17 = smov 0   ;;  %s1224_s0 = inlined_call_operand.vmem [shape: f32[64,32], index: 0, kind: input, shape index: {}]   ;;  %s1225_s1 = inlined_call_operand.vmem [shape: f32[32,128], index: 1, kind: input, shape index: {}]   ;;  %s1226_s2 = inlined_call_operand.vmem [shape: f32[1,128], index: 2, kind: input, shape index: {}]   ;;  %s1227_s3 = inlined_call_operand.vmem [shape: f32[1,128], index: 3, kind: input, shape index: {}]   ;;  %s1228_s4 = inlined_call_operand.vmem [shape: f32[1,128], index: 4, kind: input, shape index: {}]   ;;  %s1229_s5 = inlined_call_operand.vmem [shape: f32[128,128], index: 5, kind: input, shape index: {}]   ;;  %s1230_s6 = inlined_call_operand.vmem [shape: f32[1,128], index: 6, kind: input, shape index: {}]   ;;  %s1231_s7 = inlined_call_operand.vmem [shape: f32[1,128], index: 7, kind: input, shape index: {}]   ;;  %s1232_s8 = inlined_call_operand.vmem [shape: f32[1,128], index: 8, kind: input, shape index: {}]   ;;  %s1233_s9 = inlined_call_operand.vmem [shape: f32[128,128], index: 9, kind: input, shape index: {}]   ;;  %s1234_s10 = inlined_call_operand.vmem [shape: f32[1,128], index: 10, kind: input, shape index: {}]   ;;  %s1235_s11 = inlined_call_operand.vmem [shape: f32[64,128], index: 11, kind: output, shape index: {}]  }
   0x1 LB: > { %s830_s18 = sadd.s32 4294967295, %s999_s17   ;;  %p834_p0 = scmp.ge.s32.totalorder %s999_s17, 1  ;;  %s999_s17 = sphi %s1061_s17, %s21_s17  }
   0x2   : > { %p338_p1 = scmp.lt.s32.totalorder %s999_s17, 5 }
   0x4   : > { %p339_p2 = pnand %p834_p0, %p338_p1 }
   0x5   : > { %s835_s23 = sshll.u32 (!%p339_p2), %s830_s18, 1 }
   0x6   : > { %342 = sbr.rel (%p339_p2) target bundleno = 1251 (0x4e3), region = 64  ;;  %p379_p3 = scmp.lt.s32.totalorder (!%p339_p2), %s835_s23, 7 }
   0xb   : > { %v395_v0 = vld [vmem:[%s1225_s1 + $0x18] sm:$0xff]  ;;  %v394_v1 = vld [vmem:[%s1225_s1 + $0x10] sm:$0xff]  ;;  %v393_v2 = vld [vmem:[%s1225_s1 + $0x8] sm:$0xff]  ;;  %s1237_s23 = smov (!%p379_p3, %s835_s23), 7  ;;  %vm403_vm0 = vcmask 261120  }
   0xc   : > { %892 = vmatprep.subr.mxu0 %v395_v0  ;;  %v392_v3 = vld [vmem:[%s1225_s1] sm:$0xff]  ;;  %s836_s28 = sshll.u32 %s1237_s23, 3  ;;  %v543_v11 = vld [vmem:[%s1229_s5 + $0x78] sm:$0xff]  ;;  %v542_v20 = vld [vmem:[%s1229_s5 + $0x70] sm:$0xff] }
   0xd   : > { %893 = vmatpush3.msra.mxu0 %v395_v0  ;;  %s382_s12 = scalar_lea.vmem %s1224_s0, %s836_s28  ;;  %v839_v7 = vld [vmem:[%s1226_s2] ss:$0 sm:$0xff]  ;;  %903 = vmatprep.subr.mxu1 %v543_v11  ;;  %v541_v21 = vld [vmem:[%s1229_s5 + $0x68] sm:$0xff]  ;;  %v539_v23 = vld [vmem:[%s1229_s5 + $0x58] sm:$0xff]  ;;  %s388_s13 = scalar_lea.vmem %s1235_s11, %s836_s28 }
   0xe   : > { %894 = vmatprep.subr.mxu0 %v394_v1  ;;  %v390_v4 = vld [vmem:[%s382_s12] sm:$0xff]  ;;  %v391_v5 = vld [vmem:[%s382_s12 + $0x8] sm:$0xff]  ;;  %904 = vmatpush3.msra.mxu1 %v543_v11  ;;  %v538_v24 = vld [vmem:[%s1229_s5 + $0x50] sm:$0xff] }
   0xf   : > { %895 = vmatpush3.msra.mxu0 %v394_v1  ;;  %900 = vmatprep.mubr.msk.f32.mxu0 %vm403_vm0, %v390_v4  ;;  %v540_v22 = vld [vmem:[%s1229_s5 + $0x60] sm:$0xff]  ;;  %v537_v25 = vld [vmem:[%s1229_s5 + $0x48] sm:$0xff]  ;;  %v535_v27 = vld [vmem:[%s1229_s5 + $0x38] sm:$0xff] }
  0x10   : > { %896 = vmatprep.subr.mxu0 %v393_v2  ;;  %905 = vmatprep.subr.mxu1 %v542_v20  ;;  %v536_v26 = vld [vmem:[%s1229_s5 + $0x40] sm:$0xff]  ;;  %v534_v28 = vld [vmem:[%s1229_s5 + $0x30] sm:$0xff]  ;;  %v533_v29 = vld [vmem:[%s1229_s5 + $0x28] sm:$0xff] }
  0x11   : > { %897 = vmatpush3.msra.mxu0 %v393_v2  ;;  %906 = vmatpush3.msra.mxu1 %v542_v20  ;;  %v532_v30 = vld [vmem:[%s1229_s5 + $0x20] sm:$0xff]  ;;  %v531_v31 = vld [vmem:[%s1229_s5 + $0x18] sm:$0xff]  ;;  %v530_v32 = vld [vmem:[%s1229_s5 + $0x10] sm:$0xff] }
  0x12   : > { %898 = vmatprep.subr.mxu0 %v392_v3  ;;  %907 = vmatprep.subr.mxu1 %v541_v21  ;;  %v529_v33 = vld [vmem:[%s1229_s5 + $0x8] sm:$0xff]  ;;  %v528_v34 = vld [vmem:[%s1229_s5] sm:$0xff]  ;;  %v683_v58 = vld [vmem:[%s1233_s9 + $0x78] sm:$0xff] }
  0x13   : > { %899 = vmatpush3.msra.mxu0 %v392_v3  ;;  %908 = vmatpush3.msra.mxu1 %v541_v21  ;;  %v842_v42 = vld [vmem:[%s1227_s3] ss:$0 sm:$0xff]  ;;  %v682_v59 = vld [vmem:[%s1233_s9 + $0x70] sm:$0xff]  ;;  %v681_v4 = vld [vmem:[%s1233_s9 + $0x68] sm:$0xff] }
  0x14   : > { %901 = vmatmul.mubr.msk.f32.vlgmr.msra.gmra.mxu0 %vm403_vm0, %v391_v5  ;;  %909 = vmatprep.subr.mxu1 %v540_v22  ;;  %v843_v44 = vld [vmem:[%s1228_s4] ss:$0 sm:$0xff]  ;;  %v674_v11 = vld [vmem:[%s1233_s9 + $0x30] sm:$0xff] }
  0x15   : > { %910 = vmatpush3.msra.mxu1 %v540_v22  ;;  %v844_v53 = vld [vmem:[%s1230_s6] ss:$0 sm:$0xff]  ;;  %938 = vmatprep.subr.mxu0 %v683_v58 }
  0x16   : > { %911 = vmatprep.subr.mxu1 %v539_v23  ;;  %939 = vmatpush3.msra.mxu0 %v683_v58  ;;  %v680_v5 = vld [vmem:[%s1233_s9 + $0x60] sm:$0xff] }
  0x17   : > { %912 = vmatpush3.msra.mxu1 %v539_v23  ;;  %940 = vmatprep.subr.mxu0 %v682_v59 }
  0x18   : > { %913 = vmatprep.subr.mxu1 %v538_v24  ;;  %941 = vmatpush3.msra.mxu0 %v682_v59 }
  0x19   : > { %914 = vmatpush3.msra.mxu1 %v538_v24  ;;  %942 = vmatprep.subr.mxu0 %v681_v4 }
  0x1a   : > { %915 = vmatprep.subr.mxu1 %v537_v25  ;;  %943 = vmatpush3.msra.mxu0 %v681_v4 }
  0x1b   : > { %916 = vmatpush3.msra.mxu1 %v537_v25  ;;  %944 = vmatprep.subr.mxu0 %v680_v5  ;;  %v845_v25 = vld [vmem:[%s1231_s7] ss:$0 sm:$0xff] }
  0x1c   : > { %917 = vmatprep.subr.mxu1 %v536_v26  ;;  %945 = vmatpush3.msra.mxu0 %v680_v5 }
  0x1d   : > { %918 = vmatpush3.msra.mxu1 %v536_v26 }
  0x1e   : > { %919 = vmatprep.subr.mxu1 %v535_v27 }
  0x1f   : > { %920 = vmatpush3.msra.mxu1 %v535_v27 }
  0x20   : > { %921 = vmatprep.subr.mxu1 %v534_v28 }
  0x21   : > { %922 = vmatpush3.msra.mxu1 %v534_v28  ;;  %v846_v28 = vld [vmem:[%s1232_s8] ss:$0 sm:$0xff] }
  0x22   : > { %923 = vmatprep.subr.mxu1 %v533_v29 }
  0x23   : > { %924 = vmatpush3.msra.mxu1 %v533_v29 }
  0x24   : > { %925 = vmatprep.subr.mxu1 %v532_v30 }
  0x25   : > { %926 = vmatpush3.msra.mxu1 %v532_v30 }
  0x26   : > { %927 = vmatprep.subr.mxu1 %v531_v31 }
  0x27   : > { %928 = vmatpush3.msra.mxu1 %v531_v31 }
  0x28   : > { %929 = vmatprep.subr.mxu1 %v530_v32 }
  0x29   : > { %930 = vmatpush3.msra.mxu1 %v530_v32 }
  0x2a   : > { %931 = vmatprep.subr.mxu1 %v529_v33 }
  0x2b   : > { %932 = vmatpush3.msra.mxu1 %v529_v33 }
  0x2c   : > { %933 = vmatprep.subr.mxu1 %v528_v34 }
  0x2d   : > { %934 = vmatpush3.msra.mxu1 %v528_v34 }
  0xd4   : > { %v902_v6 = vpop.f32.mrf.mxu0 }
  0xd5   : > { %v482_v10 = vadd.f32 %v902_v6, %v839_v7  ;;  %v679_v6 = vld [vmem:[%s1233_s9 + $0x58] sm:$0xff] }
  0xd6   : > { %v476_v8 = vpop.f32.mrf.mxu0  ;;  %946 = vmatprep.subr.mxu0 %v679_v6 }
  0xd7   : > { %v477_v9 = vadd.f32 %v839_v7, %v476_v8  ;;  %947 = vmatpush3.msra.mxu0 %v679_v6  ;;  %v678_v7 = vld [vmem:[%s1233_s9 + $0x50] sm:$0xff]  ;;  %v677_v8 = vld [vmem:[%s1233_s9 + $0x48] sm:$0xff] }
  0xd8   : > { %948 = vmatprep.subr.mxu0 %v678_v7 }
  0xd9   : > { %487 = vadd.xlane.f32.xlu0 %v477_v9  ;;  %949 = vmatpush3.msra.mxu0 %v678_v7 }
  0xda   : > { %950 = vmatprep.subr.mxu0 %v677_v8 }
  0xdb   : > { %951 = vmatpush3.msra.mxu0 %v677_v8 }
  0xdd   : > { %489 = vadd.xlane.f32.xlu0 %v482_v10 }
 0x162   : > { %v488_v12 = vpop.xlane.xlu0 %487 }
 0x163   : > { %v492_v13 = vmul.f32 0.0078125, %v488_v12  ;;  %v673_v12 = vld [vmem:[%s1233_s9 + $0x28] sm:$0xff] }
 0x165   : > { %v1095_v14 = vsub.f32 %v477_v9, %v492_v13  ;;  %v676_v9 = vld [vmem:[%s1233_s9 + $0x40] sm:$0xff] }
 0x166   : > { %v490_v15 = vpop.xlane.xlu0 %489  ;;  %952 = vmatprep.subr.mxu0 %v676_v9  ;;  %v672_v13 = vld [vmem:[%s1233_s9 + $0x20] sm:$0xff] }
 0x167   : > { %v493_v16 = vmul.f32 0.0078125, %v490_v15  ;;  %v496_v17 = vmul.f32 %v1095_v14, %v1095_v14  ;;  %953 = vmatpush3.msra.mxu0 %v676_v9  ;;  %v670_v15 = vld [vmem:[%s1233_s9 + $0x10] sm:$0xff] }
 0x169   : > { %v1099_v18 = vsub.f32 %v482_v10, %v493_v16  ;;  %498 = vadd.xlane.f32.xlu1 %v496_v17  ;;  %v675_v10 = vld [vmem:[%s1233_s9 + $0x38] sm:$0xff]  ;;  %v669_v16 = vld [vmem:[%s1233_s9 + $0x8] sm:$0xff]  ;;  %v668_v17 = vld [vmem:[%s1233_s9] sm:$0xff] }
 0x16a   : > { %954 = vmatprep.subr.mxu0 %v675_v10 }
 0x16b   : > { %v497_v19 = vmul.f32 %v1099_v18, %v1099_v18  ;;  %955 = vmatpush3.msra.mxu0 %v675_v10 }
 0x16c   : > { %956 = vmatprep.subr.mxu0 %v674_v11 }
 0x16d   : > { %500 = vadd.xlane.f32.xlu1 %v497_v19  ;;  %957 = vmatpush3.msra.mxu0 %v674_v11 }
 0x16e   : > { %958 = vmatprep.subr.mxu0 %v673_v12 }
 0x16f   : > { %959 = vmatpush3.msra.mxu0 %v673_v12 }
 0x170   : > { %960 = vmatprep.subr.mxu0 %v672_v13 }
 0x171   : > { %961 = vmatpush3.msra.mxu0 %v672_v13 }
 0x1f2   : > { %v499_v35 = vpop.xlane.xlu1 %498 }
 0x1f3   : > { %v502_v36 = vmul.f32 0.0078125, %v499_v35 }
 0x1f5   : > { %v504_v37 = vadd.f32 1e-05, %v502_v36  ;;  %v847_v36 = vld [vmem:[%s1234_s10] ss:$0 sm:$0xff] }
 0x1f6   : > { %v501_v38 = vpop.xlane.xlu1 %500 }
 0x1f7   : > { %981 = vrsqrt.f32 %v504_v37  ;;  %v503_v39 = vmul.f32 0.0078125, %v501_v38 }
 0x1f9   : > { %v505_v40 = vadd.f32 1e-05, %v503_v39 }
 0x1fb   : > { %983 = vrsqrt.f32 %v505_v40 }
 0x204   : > { %v982_v41 = vpop.eup %981 }
 0x205   : > { %v508_v43 = vmul.f32 %v982_v41, %v1095_v14  ;;  %v671_v14 = vld [vmem:[%s1233_s9 + $0x18] sm:$0xff] }
 0x206   : > { %962 = vmatprep.subr.mxu0 %v671_v14 }
 0x207   : > { %v516_v45 = vmul.f32 %v842_v42, %v508_v43  ;;  %963 = vmatpush3.msra.mxu0 %v671_v14 }
 0x208   : > { %v984_v46 = vpop.eup %983  ;;  %964 = vmatprep.subr.mxu0 %v670_v15 }
 0x209   : > { %v509_v47 = vmul.f32 %v984_v46, %v1099_v18  ;;  %v524_v48 = vadd.f32 %v843_v44, %v516_v45  ;;  %965 = vmatpush3.msra.mxu0 %v670_v15 }
 0x20a   : > { %966 = vmatprep.subr.mxu0 %v669_v16 }
 0x20b   : > { %v517_v49 = vmul.f32 %v842_v42, %v509_v47  ;;  %v526_v50 = vmax.f32 %v524_v48, 0.0  ;;  %967 = vmatpush3.msra.mxu0 %v669_v16 }
 0x20c   : > { %968 = vmatprep.subr.mxu0 %v668_v17 }
 0x20d   : > { %v525_v51 = vadd.f32 %v843_v44, %v517_v49  ;;  %935 = vmatprep.mubr.f32.mxu1 %v526_v50  ;;  %969 = vmatpush3.msra.mxu0 %v668_v17 }
 0x20f   : > { %v527_v52 = vmax.f32 %v525_v51, 0.0 }
 0x211   : > { %936 = vmatmul.mubr.f32.vlgmr.msra.gmra.mxu1 %v527_v52 }
 0x2d1   : > { %v937_v54 = vpop.f32.mrf.mxu1 }
 0x2d2   : > { %v623_v55 = vadd.f32 %v937_v54, %v844_v53 }
 0x2d3   : > { %v617_v56 = vpop.f32.mrf.mxu1 }
 0x2d4   : > { %v618_v57 = vadd.f32 %v844_v53, %v617_v56  ;;  %630 = vadd.xlane.f32.xlu1 %v623_v55 }
 0x2d6   : > { %628 = vadd.xlane.f32.xlu0 %v618_v57 }
 0x35d   : > { %v631_v60 = vpop.xlane.xlu1 %630 }
 0x35e   : > { %v633_v61 = vmul.f32 0.0078125, %v631_v60 }
 0x35f   : > { %v629_v62 = vpop.xlane.xlu0 %628 }
 0x360   : > { %v635_v63 = vsub.f32 %v623_v55, %v633_v61  ;;  %v632_v0 = vmul.f32 0.0078125, %v629_v62 }
 0x362   : > { %v634_v1 = vsub.f32 %v618_v57, %v632_v0  ;;  %v637_v2 = vmul.f32 %v635_v63, %v635_v63 }
 0x364   : > { %640 = vadd.xlane.f32.xlu1 %v637_v2  ;;  %v636_v3 = vmul.f32 %v634_v1, %v634_v1 }
 0x366   : > { %638 = vadd.xlane.f32.xlu0 %v636_v3 }
 0x3ed   : > { %v641_v18 = vpop.xlane.xlu1 %640 }
 0x3ee   : > { %v643_v19 = vmul.f32 0.0078125, %v641_v18 }
 0x3ef   : > { %v639_v20 = vpop.xlane.xlu0 %638 }
 0x3f0   : > { %v645_v21 = vadd.f32 1e-05, %v643_v19  ;;  %v642_v22 = vmul.f32 0.0078125, %v639_v20 }
 0x3f2   : > { %985 = vrsqrt.f32 %v645_v21  ;;  %v644_v23 = vadd.f32 1e-05, %v642_v22 }
 0x3f4   : > { %987 = vrsqrt.f32 %v644_v23 }
 0x3ff   : > { %v986_v24 = vpop.eup %985 }
 0x400   : > { %v649_v26 = vmul.f32 %v986_v24, %v635_v63 }
 0x401   : > { %v988_v27 = vpop.eup %987 }
 0x402   : > { %v648_v29 = vmul.f32 %v988_v27, %v634_v1  ;;  %v657_v30 = vmul.f32 %v845_v25, %v649_v26 }
 0x404   : > { %v656_v31 = vmul.f32 %v845_v25, %v648_v29  ;;  %v665_v32 = vadd.f32 %v846_v28, %v657_v30 }
 0x406   : > { %v664_v33 = vadd.f32 %v846_v28, %v656_v31  ;;  %v667_v35 = vmax.f32 %v665_v32, 0.0 }
 0x408   : > { %v666_v34 = vmax.f32 %v664_v33, 0.0 }
 0x40a   : > { %970 = vmatprep.mubr.f32.mxu0 %v666_v34 }
 0x40b   : > { %971 = vmatmul.mubr.f32.vlgmr.msra.gmra.mxu0 %v667_v35 }
 0x4cb   : > { %v972_v37 = vpop.f32.mrf.mxu0 }
 0x4cc   : > { %v763_v38 = vadd.f32 %v972_v37, %v847_v36 }
 0x4cd   : > { %v757_v39 = vpop.f32.mrf.mxu0 }
 0x4ce   : > { %989 = vtanh.f32 %v763_v38  ;;  %v758_v40 = vadd.f32 %v847_v36, %v757_v39 }
 0x4d0   : > { %991 = vtanh.f32 %v758_v40 }
 0x4db   : > { %v990_v41 = vpop.eup %989 }
 0x4dc   : > { %v769_v43 = vmul.f32 800.0, %v990_v41 }
 0x4dd   : > { %v992_v42 = vpop.eup %991 }
 0x4de   : > { %v768_v44 = vmul.f32 800.0, %v992_v42  ;;  %v771_v46 = vadd.f32 800.0, %v769_v43 }
 0x4e0   : > { %v770_v45 = vadd.f32 800.0, %v768_v44  ;;  %773 = vst [vmem:[%s388_s13 + $0x8] sm:$0xff] %v771_v46 }
 0x4e2   : > { %772 = vst [vmem:[%s388_s13] sm:$0xff] %v770_v45 }
 0x4e3 PF: > { %s21_s17 = sadd.s32 1, %s999_s17  }
 0x4e4   : > { %p18_p4 = scmp.ge.s32.totalorder %s21_s17, 6  }
 0x4e6   :  { %20 = sbr.rel (!%p18_p4) target bundleno = 1 (0x1), region = 94 }

// kernel: _actor_forward_impl.1
= control target key start
LH: loop header
LB: loop body
LE: loop exit
PB: predicated region body
PF: predicated region fallthrough
CT: control target
= control target key end

     0   :  { %s1061_s17 = smov 0   ;;  %s1224_s0 = inlined_call_operand.vmem [shape: f32[64,32], index: 0, kind: input, shape index: {}]   ;;  %s1225_s1 = inlined_call_operand.vmem [shape: f32[32,128], index: 1, kind: input, shape index: {}]   ;;  %s1226_s2 = inlined_call_operand.vmem [shape: f32[1,128], index: 2, kind: input, shape index: {}]   ;;  %s1227_s3 = inlined_call_operand.vmem [shape: f32[1,128], index: 3, kind: input, shape index: {}]   ;;  %s1228_s4 = inlined_call_operand.vmem [shape: f32[1,128], index: 4, kind: input, shape index: {}]   ;;  %s1229_s5 = inlined_call_operand.vmem [shape: f32[128,128], index: 5, kind: input, shape index: {}]   ;;  %s1230_s6 = inlined_call_operand.vmem [shape: f32[1,128], index: 6, kind: input, shape index: {}]   ;;  %s1231_s7 = inlined_call_operand.vmem [shape: f32[1,128], index: 7, kind: input, shape index: {}]   ;;  %s1232_s8 = inlined_call_operand.vmem [shape: f32[1,128], index: 8, kind: input, shape index: {}]   ;;  %s1233_s9 = inlined_call_operand.vmem [shape: f32[128,128], index: 9, kind: input, shape index: {}]   ;;  %s1234_s10 = inlined_call_operand.vmem [shape: f32[1,128], index: 10, kind: input, shape index: {}]   ;;  %s1235_s11 = inlined_call_operand.vmem [shape: f32[64,128], index: 11, kind: output, shape index: {}]  }
   0x1 LB: > { %s830_s18 = sadd.s32 4294967295, %s999_s17   ;;  %p834_p0 = scmp.ge.s32.totalorder %s999_s17, 1  ;;  %s999_s17 = sphi %s1061_s17, %s21_s17  }
   0x2   : > { %p338_p1 = scmp.lt.s32.totalorder %s999_s17, 5 }
   0x4   : > { %p339_p2 = pnand %p834_p0, %p338_p1 }
   0x5   : > { %s835_s23 = sshll.u32 (!%p339_p2), %s830_s18, 1 }
   0x6   : > { %342 = sbr.rel (%p339_p2) target bundleno = 1251 (0x4e3), region = 64  ;;  %p379_p3 = scmp.lt.s32.totalorder (!%p339_p2), %s835_s23, 7 }
   0xb   : > { %v395_v0 = vld [vmem:[%s1225_s1 + $0x18] sm:$0xff]  ;;  %v394_v1 = vld [vmem:[%s1225_s1 + $0x10] sm:$0xff]  ;;  %v393_v2 = vld [vmem:[%s1225_s1 + $0x8] sm:$0xff]  ;;  %s1237_s23 = smov (!%p379_p3, %s835_s23), 7  ;;  %vm403_vm0 = vcmask 261120  }
   0xc   : > { %892 = vmatprep.subr.mxu0 %v395_v0  ;;  %v392_v3 = vld [vmem:[%s1225_s1] sm:$0xff]  ;;  %s836_s28 = sshll.u32 %s1237_s23, 3  ;;  %v543_v11 = vld [vmem:[%s1229_s5 + $0x78] sm:$0xff]  ;;  %v542_v20 = vld [vmem:[%s1229_s5 + $0x70] sm:$0xff] }
   0xd   : > { %893 = vmatpush3.msra.mxu0 %v395_v0  ;;  %s382_s12 = scalar_lea.vmem %s1224_s0, %s836_s28  ;;  %v839_v7 = vld [vmem:[%s1226_s2] ss:$0 sm:$0xff]  ;;  %903 = vmatprep.subr.mxu1 %v543_v11  ;;  %v541_v21 = vld [vmem:[%s1229_s5 + $0x68] sm:$0xff]  ;;  %v539_v23 = vld [vmem:[%s1229_s5 + $0x58] sm:$0xff]  ;;  %s388_s13 = scalar_lea.vmem %s1235_s11, %s836_s28 }
   0xe   : > { %894 = vmatprep.subr.mxu0 %v394_v1  ;;  %v390_v4 = vld [vmem:[%s382_s12] sm:$0xff]  ;;  %v391_v5 = vld [vmem:[%s382_s12 + $0x8] sm:$0xff]  ;;  %904 = vmatpush3.msra.mxu1 %v543_v11  ;;  %v538_v24 = vld [vmem:[%s1229_s5 + $0x50] sm:$0xff] }
   0xf   : > { %895 = vmatpush3.msra.mxu0 %v394_v1  ;;  %900 = vmatprep.mubr.msk.f32.mxu0 %vm403_vm0, %v390_v4  ;;  %v540_v22 = vld [vmem:[%s1229_s5 + $0x60] sm:$0xff]  ;;  %v537_v25 = vld [vmem:[%s1229_s5 + $0x48] sm:$0xff]  ;;  %v535_v27 = vld [vmem:[%s1229_s5 + $0x38] sm:$0xff] }
  0x10   : > { %896 = vmatprep.subr.mxu0 %v393_v2  ;;  %905 = vmatprep.subr.mxu1 %v542_v20  ;;  %v536_v26 = vld [vmem:[%s1229_s5 + $0x40] sm:$0xff]  ;;  %v534_v28 = vld [vmem:[%s1229_s5 + $0x30] sm:$0xff]  ;;  %v533_v29 = vld [vmem:[%s1229_s5 + $0x28] sm:$0xff] }
  0x11   : > { %897 = vmatpush3.msra.mxu0 %v393_v2  ;;  %906 = vmatpush3.msra.mxu1 %v542_v20  ;;  %v532_v30 = vld [vmem:[%s1229_s5 + $0x20] sm:$0xff]  ;;  %v531_v31 = vld [vmem:[%s1229_s5 + $0x18] sm:$0xff]  ;;  %v530_v32 = vld [vmem:[%s1229_s5 + $0x10] sm:$0xff] }
  0x12   : > { %898 = vmatprep.subr.mxu0 %v392_v3  ;;  %907 = vmatprep.subr.mxu1 %v541_v21  ;;  %v529_v33 = vld [vmem:[%s1229_s5 + $0x8] sm:$0xff]  ;;  %v528_v34 = vld [vmem:[%s1229_s5] sm:$0xff]  ;;  %v683_v58 = vld [vmem:[%s1233_s9 + $0x78] sm:$0xff] }
  0x13   : > { %899 = vmatpush3.msra.mxu0 %v392_v3  ;;  %908 = vmatpush3.msra.mxu1 %v541_v21  ;;  %v842_v42 = vld [vmem:[%s1227_s3] ss:$0 sm:$0xff]  ;;  %v682_v59 = vld [vmem:[%s1233_s9 + $0x70] sm:$0xff]  ;;  %v681_v4 = vld [vmem:[%s1233_s9 + $0x68] sm:$0xff] }
  0x14   : > { %901 = vmatmul.mubr.msk.f32.vlgmr.msra.gmra.mxu0 %vm403_vm0, %v391_v5  ;;  %909 = vmatprep.subr.mxu1 %v540_v22  ;;  %v843_v44 = vld [vmem:[%s1228_s4] ss:$0 sm:$0xff]  ;;  %v674_v11 = vld [vmem:[%s1233_s9 + $0x30] sm:$0xff] }
  0x15   : > { %910 = vmatpush3.msra.mxu1 %v540_v22  ;;  %v844_v53 = vld [vmem:[%s1230_s6] ss:$0 sm:$0xff]  ;;  %938 = vmatprep.subr.mxu0 %v683_v58 }
  0x16   : > { %911 = vmatprep.subr.mxu1 %v539_v23  ;;  %939 = vmatpush3.msra.mxu0 %v683_v58  ;;  %v680_v5 = vld [vmem:[%s1233_s9 + $0x60] sm:$0xff] }
  0x17   : > { %912 = vmatpush3.msra.mxu1 %v539_v23  ;;  %940 = vmatprep.subr.mxu0 %v682_v59 }
  0x18   : > { %913 = vmatprep.subr.mxu1 %v538_v24  ;;  %941 = vmatpush3.msra.mxu0 %v682_v59 }
  0x19   : > { %914 = vmatpush3.msra.mxu1 %v538_v24  ;;  %942 = vmatprep.subr.mxu0 %v681_v4 }
  0x1a   : > { %915 = vmatprep.subr.mxu1 %v537_v25  ;;  %943 = vmatpush3.msra.mxu0 %v681_v4 }
  0x1b   : > { %916 = vmatpush3.msra.mxu1 %v537_v25  ;;  %944 = vmatprep.subr.mxu0 %v680_v5  ;;  %v845_v25 = vld [vmem:[%s1231_s7] ss:$0 sm:$0xff] }
  0x1c   : > { %917 = vmatprep.subr.mxu1 %v536_v26  ;;  %945 = vmatpush3.msra.mxu0 %v680_v5 }
  0x1d   : > { %918 = vmatpush3.msra.mxu1 %v536_v26 }
  0x1e   : > { %919 = vmatprep.subr.mxu1 %v535_v27 }
  0x1f   : > { %920 = vmatpush3.msra.mxu1 %v535_v27 }
  0x20   : > { %921 = vmatprep.subr.mxu1 %v534_v28 }
  0x21   : > { %922 = vmatpush3.msra.mxu1 %v534_v28  ;;  %v846_v28 = vld [vmem:[%s1232_s8] ss:$0 sm:$0xff] }
  0x22   : > { %923 = vmatprep.subr.mxu1 %v533_v29 }
  0x23   : > { %924 = vmatpush3.msra.mxu1 %v533_v29 }
  0x24   : > { %925 = vmatprep.subr.mxu1 %v532_v30 }
  0x25   : > { %926 = vmatpush3.msra.mxu1 %v532_v30 }
  0x26   : > { %927 = vmatprep.subr.mxu1 %v531_v31 }
  0x27   : > { %928 = vmatpush3.msra.mxu1 %v531_v31 }
  0x28   : > { %929 = vmatprep.subr.mxu1 %v530_v32 }
  0x29   : > { %930 = vmatpush3.msra.mxu1 %v530_v32 }
  0x2a   : > { %931 = vmatprep.subr.mxu1 %v529_v33 }
  0x2b   : > { %932 = vmatpush3.msra.mxu1 %v529_v33 }
  0x2c   : > { %933 = vmatprep.subr.mxu1 %v528_v34 }
  0x2d   : > { %934 = vmatpush3.msra.mxu1 %v528_v34 }
  0xd4   : > { %v902_v6 = vpop.f32.mrf.mxu0 }
  0xd5   : > { %v482_v10 = vadd.f32 %v902_v6, %v839_v7  ;;  %v679_v6 = vld [vmem:[%s1233_s9 + $0x58] sm:$0xff] }
  0xd6   : > { %v476_v8 = vpop.f32.mrf.mxu0  ;;  %946 = vmatprep.subr.mxu0 %v679_v6 }
  0xd7   : > { %v477_v9 = vadd.f32 %v839_v7, %v476_v8  ;;  %947 = vmatpush3.msra.mxu0 %v679_v6  ;;  %v678_v7 = vld [vmem:[%s1233_s9 + $0x50] sm:$0xff]  ;;  %v677_v8 = vld [vmem:[%s1233_s9 + $0x48] sm:$0xff] }
  0xd8   : > { %948 = vmatprep.subr.mxu0 %v678_v7 }
  0xd9   : > { %487 = vadd.xlane.f32.xlu0 %v477_v9  ;;  %949 = vmatpush3.msra.mxu0 %v678_v7 }
  0xda   : > { %950 = vmatprep.subr.mxu0 %v677_v8 }
  0xdb   : > { %951 = vmatpush3.msra.mxu0 %v677_v8 }
  0xdd   : > { %489 = vadd.xlane.f32.xlu0 %v482_v10 }
 0x162   : > { %v488_v12 = vpop.xlane.xlu0 %487 }
 0x163   : > { %v492_v13 = vmul.f32 0.0078125, %v488_v12  ;;  %v673_v12 = vld [vmem:[%s1233_s9 + $0x28] sm:$0xff] }
 0x165   : > { %v1095_v14 = vsub.f32 %v477_v9, %v492_v13  ;;  %v676_v9 = vld [vmem:[%s1233_s9 + $0x40] sm:$0xff] }
 0x166   : > { %v490_v15 = vpop.xlane.xlu0 %489  ;;  %952 = vmatprep.subr.mxu0 %v676_v9  ;;  %v672_v13 = vld [vmem:[%s1233_s9 + $0x20] sm:$0xff] }
 0x167   : > { %v493_v16 = vmul.f32 0.0078125, %v490_v15  ;;  %v496_v17 = vmul.f32 %v1095_v14, %v1095_v14  ;;  %953 = vmatpush3.msra.mxu0 %v676_v9  ;;  %v670_v15 = vld [vmem:[%s1233_s9 + $0x10] sm:$0xff] }
 0x169   : > { %v1099_v18 = vsub.f32 %v482_v10, %v493_v16  ;;  %498 = vadd.xlane.f32.xlu1 %v496_v17  ;;  %v675_v10 = vld [vmem:[%s1233_s9 + $0x38] sm:$0xff]  ;;  %v669_v16 = vld [vmem:[%s1233_s9 + $0x8] sm:$0xff]  ;;  %v668_v17 = vld [vmem:[%s1233_s9] sm:$0xff] }
 0x16a   : > { %954 = vmatprep.subr.mxu0 %v675_v10 }
 0x16b   : > { %v497_v19 = vmul.f32 %v1099_v18, %v1099_v18  ;;  %955 = vmatpush3.msra.mxu0 %v675_v10 }
 0x16c   : > { %956 = vmatprep.subr.mxu0 %v674_v11 }
 0x16d   : > { %500 = vadd.xlane.f32.xlu1 %v497_v19  ;;  %957 = vmatpush3.msra.mxu0 %v674_v11 }
 0x16e   : > { %958 = vmatprep.subr.mxu0 %v673_v12 }
 0x16f   : > { %959 = vmatpush3.msra.mxu0 %v673_v12 }
 0x170   : > { %960 = vmatprep.subr.mxu0 %v672_v13 }
 0x171   : > { %961 = vmatpush3.msra.mxu0 %v672_v13 }
 0x1f2   : > { %v499_v35 = vpop.xlane.xlu1 %498 }
 0x1f3   : > { %v502_v36 = vmul.f32 0.0078125, %v499_v35 }
 0x1f5   : > { %v504_v37 = vadd.f32 1e-05, %v502_v36  ;;  %v847_v36 = vld [vmem:[%s1234_s10] ss:$0 sm:$0xff] }
 0x1f6   : > { %v501_v38 = vpop.xlane.xlu1 %500 }
 0x1f7   : > { %981 = vrsqrt.f32 %v504_v37  ;;  %v503_v39 = vmul.f32 0.0078125, %v501_v38 }
 0x1f9   : > { %v505_v40 = vadd.f32 1e-05, %v503_v39 }
 0x1fb   : > { %983 = vrsqrt.f32 %v505_v40 }
 0x204   : > { %v982_v41 = vpop.eup %981 }
 0x205   : > { %v508_v43 = vmul.f32 %v982_v41, %v1095_v14  ;;  %v671_v14 = vld [vmem:[%s1233_s9 + $0x18] sm:$0xff] }
 0x206   : > { %962 = vmatprep.subr.mxu0 %v671_v14 }
 0x207   : > { %v516_v45 = vmul.f32 %v842_v42, %v508_v43  ;;  %963 = vmatpush3.msra.mxu0 %v671_v14 }
 0x208   : > { %v984_v46 = vpop.eup %983  ;;  %964 = vmatprep.subr.mxu0 %v670_v15 }
 0x209   : > { %v509_v47 = vmul.f32 %v984_v46, %v1099_v18  ;;  %v524_v48 = vadd.f32 %v843_v44, %v516_v45  ;;  %965 = vmatpush3.msra.mxu0 %v670_v15 }
 0x20a   : > { %966 = vmatprep.subr.mxu0 %v669_v16 }
 0x20b   : > { %v517_v49 = vmul.f32 %v842_v42, %v509_v47  ;;  %v526_v50 = vmax.f32 %v524_v48, 0.0  ;;  %967 = vmatpush3.msra.mxu0 %v669_v16 }
 0x20c   : > { %968 = vmatprep.subr.mxu0 %v668_v17 }
 0x20d   : > { %v525_v51 = vadd.f32 %v843_v44, %v517_v49  ;;  %935 = vmatprep.mubr.f32.mxu1 %v526_v50  ;;  %969 = vmatpush3.msra.mxu0 %v668_v17 }
 0x20f   : > { %v527_v52 = vmax.f32 %v525_v51, 0.0 }
 0x211   : > { %936 = vmatmul.mubr.f32.vlgmr.msra.gmra.mxu1 %v527_v52 }
 0x2d1   : > { %v937_v54 = vpop.f32.mrf.mxu1 }
 0x2d2   : > { %v623_v55 = vadd.f32 %v937_v54, %v844_v53 }
 0x2d3   : > { %v617_v56 = vpop.f32.mrf.mxu1 }
 0x2d4   : > { %v618_v57 = vadd.f32 %v844_v53, %v617_v56  ;;  %630 = vadd.xlane.f32.xlu1 %v623_v55 }
 0x2d6   : > { %628 = vadd.xlane.f32.xlu0 %v618_v57 }
 0x35d   : > { %v631_v60 = vpop.xlane.xlu1 %630 }
 0x35e   : > { %v633_v61 = vmul.f32 0.0078125, %v631_v60 }
 0x35f   : > { %v629_v62 = vpop.xlane.xlu0 %628 }
 0x360   : > { %v635_v63 = vsub.f32 %v623_v55, %v633_v61  ;;  %v632_v0 = vmul.f32 0.0078125, %v629_v62 }
 0x362   : > { %v634_v1 = vsub.f32 %v618_v57, %v632_v0  ;;  %v637_v2 = vmul.f32 %v635_v63, %v635_v63 }
 0x364   : > { %640 = vadd.xlane.f32.xlu1 %v637_v2  ;;  %v636_v3 = vmul.f32 %v634_v1, %v634_v1 }
 0x366   : > { %638 = vadd.xlane.f32.xlu0 %v636_v3 }
 0x3ed   : > { %v641_v18 = vpop.xlane.xlu1 %640 }
 0x3ee   : > { %v643_v19 = vmul.f32 0.0078125, %v641_v18 }
 0x3ef   : > { %v639_v20 = vpop.xlane.xlu0 %638 }
 0x3f0   : > { %v645_v21 = vadd.f32 1e-05, %v643_v19  ;;  %v642_v22 = vmul.f32 0.0078125, %v639_v20 }
 0x3f2   : > { %985 = vrsqrt.f32 %v645_v21  ;;  %v644_v23 = vadd.f32 1e-05, %v642_v22 }
 0x3f4   : > { %987 = vrsqrt.f32 %v644_v23 }
 0x3ff   : > { %v986_v24 = vpop.eup %985 }
 0x400   : > { %v649_v26 = vmul.f32 %v986_v24, %v635_v63 }
 0x401   : > { %v988_v27 = vpop.eup %987 }
 0x402   : > { %v648_v29 = vmul.f32 %v988_v27, %v634_v1  ;;  %v657_v30 = vmul.f32 %v845_v25, %v649_v26 }
 0x404   : > { %v656_v31 = vmul.f32 %v845_v25, %v648_v29  ;;  %v665_v32 = vadd.f32 %v846_v28, %v657_v30 }
 0x406   : > { %v664_v33 = vadd.f32 %v846_v28, %v656_v31  ;;  %v667_v35 = vmax.f32 %v665_v32, 0.0 }
 0x408   : > { %v666_v34 = vmax.f32 %v664_v33, 0.0 }
 0x40a   : > { %970 = vmatprep.mubr.f32.mxu0 %v666_v34 }
 0x40b   : > { %971 = vmatmul.mubr.f32.vlgmr.msra.gmra.mxu0 %v667_v35 }
 0x4cb   : > { %v972_v37 = vpop.f32.mrf.mxu0 }
 0x4cc   : > { %v763_v38 = vadd.f32 %v972_v37, %v847_v36 }
 0x4cd   : > { %v757_v39 = vpop.f32.mrf.mxu0 }
 0x4ce   : > { %989 = vtanh.f32 %v763_v38  ;;  %v758_v40 = vadd.f32 %v847_v36, %v757_v39 }
 0x4d0   : > { %991 = vtanh.f32 %v758_v40 }
 0x4db   : > { %v990_v41 = vpop.eup %989 }
 0x4dc   : > { %v769_v43 = vmul.f32 800.0, %v990_v41 }
 0x4dd   : > { %v992_v42 = vpop.eup %991 }
 0x4de   : > { %v768_v44 = vmul.f32 800.0, %v992_v42  ;;  %v771_v46 = vadd.f32 800.0, %v769_v43 }
 0x4e0   : > { %v770_v45 = vadd.f32 800.0, %v768_v44  ;;  %773 = vst [vmem:[%s388_s13 + $0x8] sm:$0xff] %v771_v46 }
 0x4e2   : > { %772 = vst [vmem:[%s388_s13] sm:$0xff] %v770_v45 }
 0x4e3 PF: > { %s21_s17 = sadd.s32 1, %s999_s17  }
 0x4e4   : > { %p18_p4 = scmp.ge.s32.totalorder %s21_s17, 6  }
 0x4e6   :  { %20 = sbr.rel (!%p18_p4) target bundleno = 1 (0x1), region = 94 }

</bundles_post_ra>
